<compile_context>
chip_gen: v7x
topology: tpu7x:2x2x1
jax: 0.10.0
libtpu: 0.0.40
codegen_flags: <defaults>
</compile_context>

<pallas_src>
import functools
import math

import jax
import jax.numpy as jnp
from jax.experimental import pallas as pl
from jax.experimental.pallas import tpu as pltpu


# ---------------------------------------------------------------------------
# Fused Pallas kernel: encoder MLP -> (mu, logvar) -> reparameterize -> decoder
# ---------------------------------------------------------------------------
def _make_vae_recon_kernel(num_enc_layers):
    def kernel(*refs):
        idx = 0
        x_ref = refs[idx]; idx += 1
        eps_ref = refs[idx]; idx += 1
        enc_refs = []
        for _ in range(num_enc_layers):
            enc_refs.append((refs[idx], refs[idx + 1]))
            idx += 2
        w_mu_ref, b_mu_ref = refs[idx], refs[idx + 1]; idx += 2
        w_lv_ref, b_lv_ref = refs[idx], refs[idx + 1]; idx += 2
        w_d1_ref, b_d1_ref = refs[idx], refs[idx + 1]; idx += 2
        w_d2_ref, b_d2_ref = refs[idx], refs[idx + 1]; idx += 2
        xrecon_ref, mu_ref, logvar_ref = refs[idx], refs[idx + 1], refs[idx + 2]

        # --- VAE encoder: (Linear -> ReLU -> Dropout) x (n_layers - 1) ---
        # TODO(synk): training-mode nn.Dropout not applied (inference semantics).
        h = x_ref[...]
        for w_ref, b_ref in enc_refs:
            h = jnp.maximum(
                jnp.dot(h, w_ref[...], preferred_element_type=jnp.float32)
                + b_ref[...],
                0.0,
            )

        # --- mu / logvar heads (f32 accumulation on the MXU) ---
        mu = jnp.dot(h, w_mu_ref[...], preferred_element_type=jnp.float32) + b_mu_ref[...]
        logvar = jnp.dot(h, w_lv_ref[...], preferred_element_type=jnp.float32) + b_lv_ref[...]

        # --- reparameterization: z = mu + eps * exp(0.5 * logvar) ---
        z = mu + eps_ref[...] * jnp.exp(0.5 * logvar)

        # --- decoder: Linear -> ReLU -> Linear ---
        d1 = jnp.maximum(
            jnp.dot(z, w_d1_ref[...], preferred_element_type=jnp.float32)
            + b_d1_ref[...],
            0.0,
        )
        xrecon_ref[...] = (
            jnp.dot(d1, w_d2_ref[...], preferred_element_type=jnp.float32)
            + b_d2_ref[...]
        )
        mu_ref[...] = mu
        logvar_ref[...] = logvar

    return kernel


# ---------------------------------------------------------------------------
# Wrapper
# ---------------------------------------------------------------------------
@jax.jit
def reconstruction_vae_forward(x, eps, params):
    """x: (B, in_dim) latent, eps: (B, latent_dim) gaussian noise.

    Returns (x_recon (B, out_dim), mu (B, latent_dim), logvar (B, latent_dim)).
    """
    batch = x.shape[0]
    latent_dim = params["w_mu"].shape[-1]
    out_dim = params["w_dec2"].shape[-1]
    enc_layers = params["encoder"]

    inputs = [x, eps]
    for w, b in enc_layers:
        inputs += [w, b]
    inputs += [
        params["w_mu"], params["b_mu"],
        params["w_logvar"], params["b_logvar"],
        params["w_dec1"], params["b_dec1"],
        params["w_dec2"], params["b_dec2"],
    ]

    vmem = pl.BlockSpec(memory_space=pltpu.MemorySpace.VMEM)
    out_shapes = (
        jax.ShapeDtypeStruct((batch, out_dim), jnp.float32),
        jax.ShapeDtypeStruct((batch, latent_dim), jnp.float32),
        jax.ShapeDtypeStruct((batch, latent_dim), jnp.float32),
    )
    return pl.pallas_call(
        _make_vae_recon_kernel(len(enc_layers)),
        out_shape=out_shapes,
        in_specs=[vmem] * len(inputs),
        out_specs=(vmem, vmem, vmem),
    )(*inputs)


# ---------------------------------------------------------------------------
# Parameter init (PyTorch nn.Linear default: U(-1/sqrt(fan_in), 1/sqrt(fan_in)))
# ---------------------------------------------------------------------------
def init_params(key, in_dim, hid_dim, out_dim, n_layers):
    def linear_init(k, fan_in, fan_out):
        bound = 1.0 / math.sqrt(fan_in)
        k1, k2 = jax.random.split(k)
        w = jax.random.uniform(k1, (fan_in, fan_out), jnp.float32, -bound, bound)
        b = jax.random.uniform(k2, (1, fan_out), jnp.float32, -bound, bound)
        return w, b

    latent_dim = hid_dim
    params = {"encoder": []}
    d = in_dim
    for _ in range(n_layers - 1):
        key, sub = jax.random.split(key)
        params["encoder"].append(linear_init(sub, d, hid_dim))
        d = hid_dim

    key, kmu, klv, kd1, kd2 = jax.random.split(key, 5)
    params["w_mu"], params["b_mu"] = linear_init(kmu, hid_dim, latent_dim)
    params["w_logvar"], params["b_logvar"] = linear_init(klv, hid_dim, latent_dim)
    params["w_dec1"], params["b_dec1"] = linear_init(kd1, latent_dim, hid_dim)
    params["w_dec2"], params["b_dec2"] = linear_init(kd2, hid_dim, out_dim)
    return params


# ---------------------------------------------------------------------------
# Pure-JAX reference (for correctness check)
# ---------------------------------------------------------------------------
def reference_forward(x, eps, params):
    h = x
    for w, b in params["encoder"]:
        h = jnp.maximum(h @ w + b, 0.0)
    mu = h @ params["w_mu"] + params["b_mu"]
    logvar = h @ params["w_logvar"] + params["b_logvar"]
    z = mu + eps * jnp.exp(0.5 * logvar)
    d1 = jnp.maximum(z @ params["w_dec1"] + params["b_dec1"], 0.0)
    x_recon = d1 @ params["w_dec2"] + params["b_dec2"]
    return x_recon, mu, logvar


# ---------------------------------------------------------------------------
# Main
# ---------------------------------------------------------------------------
if __name__ == "__main__":
    window_size = 8        # stored by the module but unused in forward()
    in_dim = 16
    hid_dim = 32           # latent_dim = hid_dim in the module
    out_dim = 8
    n_layers = 2
    dropout = 0.0          # inference: dropout is identity
    batch = 2

    key = jax.random.PRNGKey(0)
    key, xkey, ekey = jax.random.split(key, 3)
    x = jax.random.normal(xkey, (batch, in_dim), jnp.float32)
    # torch.randn_like(std) equivalent, drawn deterministically outside the kernel.
    eps = jax.random.normal(ekey, (batch, hid_dim), jnp.float32)

    params = init_params(key, in_dim, hid_dim, out_dim, n_layers)

    x_recon, mu, logvar = jax.block_until_ready(
        reconstruction_vae_forward(x, eps, params)
    )

    assert x_recon.shape == (batch, out_dim), x_recon.shape
    assert mu.shape == (batch, hid_dim), mu.shape
    assert logvar.shape == (batch, hid_dim), logvar.shape
    assert all(bool(jnp.all(jnp.isfinite(a))) for a in (x_recon, mu, logvar))

    xr_ref, mu_ref, lv_ref = reference_forward(x, eps, params)
    assert bool(jnp.allclose(x_recon, xr_ref, atol=1e-4, rtol=1e-4))
    assert bool(jnp.allclose(mu, mu_ref, atol=1e-4, rtol=1e-4))
    assert bool(jnp.allclose(logvar, lv_ref, atol=1e-4, rtol=1e-4))

    print("KERNEL_OK")
</pallas_src>

<mosaic_0001>
module attributes {stable_mosaic.version = 11 : i64} {
  func.func @kernel(%arg0: memref<2x16xf32, #tpu.memory_space<vmem>>, %arg1: memref<2x32xf32, #tpu.memory_space<vmem>>, %arg2: memref<16x32xf32, #tpu.memory_space<vmem>>, %arg3: memref<1x32xf32, #tpu.memory_space<vmem>>, %arg4: memref<32x32xf32, #tpu.memory_space<vmem>>, %arg5: memref<1x32xf32, #tpu.memory_space<vmem>>, %arg6: memref<32x32xf32, #tpu.memory_space<vmem>>, %arg7: memref<1x32xf32, #tpu.memory_space<vmem>>, %arg8: memref<32x32xf32, #tpu.memory_space<vmem>>, %arg9: memref<1x32xf32, #tpu.memory_space<vmem>>, %arg10: memref<32x8xf32, #tpu.memory_space<vmem>>, %arg11: memref<1x8xf32, #tpu.memory_space<vmem>>, %arg12: memref<2x8xf32, #tpu.memory_space<vmem>>, %arg13: memref<2x32xf32, #tpu.memory_space<vmem>>, %arg14: memref<2x32xf32, #tpu.memory_space<vmem>>) attributes {dimension_semantics = [], scalar_prefetch = 0 : i64, scratch_operands = 0 : i64, tpu.core_type = #tpu.core_type<tc>} {
    %c0 = arith.constant 0 : index
    %c0_0 = arith.constant 0 : index
    %0 = vector.load %arg0[%c0, %c0_0] : memref<2x16xf32, #tpu.memory_space<vmem>>, vector<2x16xf32>
    %c0_1 = arith.constant 0 : index
    %c0_2 = arith.constant 0 : index
    %1 = vector.load %arg2[%c0_1, %c0_2] : memref<16x32xf32, #tpu.memory_space<vmem>>, vector<16x32xf32>
    %cst = arith.constant dense<0.000000e+00> : vector<2x32xf32>
    %2 = tpu.matmul %0, %1, %cst {dimension_numbers = #tpu.dot_dimension_numbers<[1], [0], [0], [1], [0, 0, 1, 1], [], []>} : vector<2x16xf32>, vector<16x32xf32>, vector<2x32xf32> -> vector<2x32xf32>
    %c0_3 = arith.constant 0 : index
    %c0_4 = arith.constant 0 : index
    %3 = vector.load %arg3[%c0_3, %c0_4] : memref<1x32xf32, #tpu.memory_space<vmem>>, vector<1x32xf32>
    %4 = vector.broadcast %3 : vector<1x32xf32> to vector<2x32xf32>
    %5 = arith.addf %2, %4 : vector<2x32xf32>
    %cst_5 = arith.constant 0.000000e+00 : f32
    %6 = vector.broadcast %cst_5 : f32 to vector<2x32xf32>
    %7 = arith.maximumf %5, %6 : vector<2x32xf32>
    %c0_6 = arith.constant 0 : index
    %c0_7 = arith.constant 0 : index
    %8 = vector.load %arg4[%c0_6, %c0_7] : memref<32x32xf32, #tpu.memory_space<vmem>>, vector<32x32xf32>
    %cst_8 = arith.constant dense<0.000000e+00> : vector<2x32xf32>
    %9 = tpu.matmul %7, %8, %cst_8 {dimension_numbers = #tpu.dot_dimension_numbers<[1], [0], [0], [1], [0, 0, 1, 1], [], []>} : vector<2x32xf32>, vector<32x32xf32>, vector<2x32xf32> -> vector<2x32xf32>
    %c0_9 = arith.constant 0 : index
    %c0_10 = arith.constant 0 : index
    %10 = vector.load %arg5[%c0_9, %c0_10] : memref<1x32xf32, #tpu.memory_space<vmem>>, vector<1x32xf32>
    %11 = vector.broadcast %10 : vector<1x32xf32> to vector<2x32xf32>
    %12 = arith.addf %9, %11 : vector<2x32xf32>
    %c0_11 = arith.constant 0 : index
    %c0_12 = arith.constant 0 : index
    %13 = vector.load %arg6[%c0_11, %c0_12] : memref<32x32xf32, #tpu.memory_space<vmem>>, vector<32x32xf32>
    %cst_13 = arith.constant dense<0.000000e+00> : vector<2x32xf32>
    %14 = tpu.matmul %7, %13, %cst_13 {dimension_numbers = #tpu.dot_dimension_numbers<[1], [0], [0], [1], [0, 0, 1, 1], [], []>} : vector<2x32xf32>, vector<32x32xf32>, vector<2x32xf32> -> vector<2x32xf32>
    %c0_14 = arith.constant 0 : index
    %c0_15 = arith.constant 0 : index
    %15 = vector.load %arg7[%c0_14, %c0_15] : memref<1x32xf32, #tpu.memory_space<vmem>>, vector<1x32xf32>
    %16 = vector.broadcast %15 : vector<1x32xf32> to vector<2x32xf32>
    %17 = arith.addf %14, %16 : vector<2x32xf32>
    %c0_16 = arith.constant 0 : index
    %c0_17 = arith.constant 0 : index
    %18 = vector.load %arg1[%c0_16, %c0_17] : memref<2x32xf32, #tpu.memory_space<vmem>>, vector<2x32xf32>
    %cst_18 = arith.constant 5.000000e-01 : f32
    %19 = vector.broadcast %cst_18 : f32 to vector<2x32xf32>
    %20 = arith.mulf %19, %17 : vector<2x32xf32>
    %21 = math.exp %20 : vector<2x32xf32>
    %22 = arith.mulf %18, %21 : vector<2x32xf32>
    %23 = arith.addf %12, %22 : vector<2x32xf32>
    %c0_19 = arith.constant 0 : index
    %c0_20 = arith.constant 0 : index
    %24 = vector.load %arg8[%c0_19, %c0_20] : memref<32x32xf32, #tpu.memory_space<vmem>>, vector<32x32xf32>
    %cst_21 = arith.constant dense<0.000000e+00> : vector<2x32xf32>
    %25 = tpu.matmul %23, %24, %cst_21 {dimension_numbers = #tpu.dot_dimension_numbers<[1], [0], [0], [1], [0, 0, 1, 1], [], []>} : vector<2x32xf32>, vector<32x32xf32>, vector<2x32xf32> -> vector<2x32xf32>
    %c0_22 = arith.constant 0 : index
    %c0_23 = arith.constant 0 : index
    %26 = vector.load %arg9[%c0_22, %c0_23] : memref<1x32xf32, #tpu.memory_space<vmem>>, vector<1x32xf32>
    %27 = vector.broadcast %26 : vector<1x32xf32> to vector<2x32xf32>
    %28 = arith.addf %25, %27 : vector<2x32xf32>
    %cst_24 = arith.constant 0.000000e+00 : f32
    %29 = vector.broadcast %cst_24 : f32 to vector<2x32xf32>
    %30 = arith.maximumf %28, %29 : vector<2x32xf32>
    %c0_25 = arith.constant 0 : index
    %c0_26 = arith.constant 0 : index
    %31 = vector.load %arg10[%c0_25, %c0_26] : memref<32x8xf32, #tpu.memory_space<vmem>>, vector<32x8xf32>
    %cst_27 = arith.constant dense<0.000000e+00> : vector<2x8xf32>
    %32 = tpu.matmul %30, %31, %cst_27 {dimension_numbers = #tpu.dot_dimension_numbers<[1], [0], [0], [1], [0, 0, 1, 1], [], []>} : vector<2x32xf32>, vector<32x8xf32>, vector<2x8xf32> -> vector<2x8xf32>
    %c0_28 = arith.constant 0 : index
    %c0_29 = arith.constant 0 : index
    %33 = vector.load %arg11[%c0_28, %c0_29] : memref<1x8xf32, #tpu.memory_space<vmem>>, vector<1x8xf32>
    %34 = vector.broadcast %33 : vector<1x8xf32> to vector<2x8xf32>
    %35 = arith.addf %32, %34 : vector<2x8xf32>
    %c0_30 = arith.constant 0 : index
    %c0_31 = arith.constant 0 : index
    %36 = vector.load %arg12[%c0_30, %c0_31] : memref<2x8xf32, #tpu.memory_space<vmem>>, vector<2x8xf32>
    tpu.vector_store %arg12[%c0_30, %c0_31], %35 {strides = array<i32>} : memref<2x8xf32, #tpu.memory_space<vmem>>, vector<2x8xf32>,
    %c0_32 = arith.constant 0 : index
    %c0_33 = arith.constant 0 : index
    %37 = vector.load %arg13[%c0_32, %c0_33] : memref<2x32xf32, #tpu.memory_space<vmem>>, vector<2x32xf32>
    tpu.vector_store %arg13[%c0_32, %c0_33], %12 {strides = array<i32>} : memref<2x32xf32, #tpu.memory_space<vmem>>, vector<2x32xf32>,
    %c0_34 = arith.constant 0 : index
    %c0_35 = arith.constant 0 : index
    %38 = vector.load %arg14[%c0_34, %c0_35] : memref<2x32xf32, #tpu.memory_space<vmem>>, vector<2x32xf32>
    tpu.vector_store %arg14[%c0_34, %c0_35], %17 {strides = array<i32>} : memref<2x32xf32, #tpu.memory_space<vmem>>, vector<2x32xf32>,
    return
  }
}

</mosaic_0001>

<bundles_post_ra>
// kernel: reconstruction_vae_forward.1
= control target key start
LH: loop header
LB: loop body
LE: loop exit
PB: predicated region body
PF: predicated region fallthrough
CT: control target
= control target key end

     0   :  { %20 = vsyncpa [#allocation3], 0  ;;  %s1282_s0 = inlined_call_operand.vmem [shape: f32[2,16], index: 0, kind: input, shape index: {}]   ;;  %s1283_s1 = inlined_call_operand.hbm [shape: f32[2,32], index: 1, kind: input, shape index: {}]   ;;  %s1284_s2 = inlined_call_operand.hbm [shape: f32[16,32], index: 2, kind: input, shape index: {}]   ;;  %s1285_s3 = inlined_call_operand.hbm [shape: f32[1,32], index: 3, kind: input, shape index: {}]   ;;  %s1286_s4 = inlined_call_operand.vmem [shape: f32[32,32], index: 4, kind: input, shape index: {}]   ;;  %s1287_s5 = inlined_call_operand.hbm [shape: f32[1,32], index: 5, kind: input, shape index: {}]   ;;  %s1288_s6 = inlined_call_operand.vmem [shape: f32[32,32], index: 6, kind: input, shape index: {}]   ;;  %s1289_s7 = inlined_call_operand.hbm [shape: f32[1,32], index: 7, kind: input, shape index: {}]   ;;  %s1290_s8 = inlined_call_operand.hbm [shape: f32[32,32], index: 8, kind: input, shape index: {}]   ;;  %s1291_s9 = inlined_call_operand.hbm [shape: f32[1,32], index: 9, kind: input, shape index: {}]   ;;  %s1292_s10 = inlined_call_operand.vmem [shape: f32[32,8], index: 10, kind: input, shape index: {}]   ;;  %s1293_s11 = inlined_call_operand.hbm [shape: f32[1,8], index: 11, kind: input, shape index: {}]   ;;  %s1294_s12 = inlined_call_operand.hbm [shape: f32[2,8], index: 12, kind: output, shape index: {0}]   ;;  %s1295_s13 = inlined_call_operand.hbm [shape: f32[2,32], index: 13, kind: output, shape index: {1}]   ;;  %s1296_s14 = inlined_call_operand.hbm [shape: f32[2,32], index: 14, kind: output, shape index: {2}]  }
   0x1   :  { %21 = vsyncpa [#allocation6], 0 }
   0x2   :  { %22 = vsyncpa [#allocation9], 0 }
   0x3   :  { %23 = vsyncpa [#allocation12], 0 }
   0x4   :  { %24 = vsyncpa [#allocation15], 0 }
   0x5   :  { %25 = vsyncpa [#allocation4], 0 }
   0x6   :  { %26 = vsyncpa [#allocation18], 0  ;;  %s1005_s29 = smov [#allocation5]   ;;  %s749_s17 = scalar_lea.hbm %s1284_s2, 256 }
   0x7   :  { %s44_s30 = sshll.u32 %s1005_s29, 4  ;;  %p750_p0 = scmp.ne.s32.totalorder %s1284_s2, %s749_s17  ;;  %s45_s30 = int_to_ptr.vmem [resolvable:$true] %s44_s30 }
   0x8   :  { %p753_p1 = scmp.lt.u32.totalorder %s749_s17, %s1284_s2 }
   0xa   :  { %p755_p2 = pnand %p753_p1, %p750_p0 }
   0xc   :  { %758 = shalt.err (!%p755_p2)
}
   0xd   :  { %s759_s22 = scalar_lea.vmem %s45_s30, 256  ;;  %p764_p4 = scmp.lt.s32.totalorder %s45_s30, %s45_s30 }
   0xe   :  { %p760_p3 = scmp.ne.s32.totalorder %s45_s30, %s759_s22  ;;  %p765_p5 = scmp.lt.s32.totalorder %s759_s22, %s759_s22 }
  0x10   :  { %p766_p6 = por %p765_p5, %p764_p4 }
  0x12   :  { %p767_p7 = pnand %p766_p6, %p760_p3 }
  0x14   :  { %770 = shalt.err (!%p767_p7)
}
  0x15   :  { %s1006_s23 = smov 128   ;;  %s1007_s24 = smov 8  }
  0x16   :  { %50 = dma.hbm_to_vmem [thread:$0]  %s1284_s2, 256, %s45_s30, [#allocation6], %s1006_s23, %s1006_s23, %s1007_s24  }
  0x17   :  { %s1008_s27 = smov [#allocation8]   ;;  %s1009_s29 = smov [#allocation11]  }
  0x18   :  { %s69_s28 = sshll.u32 %s1008_s27, 4  ;;  %s90_s15 = sshll.u32 %s1009_s29, 4  ;;  %s70_s28 = int_to_ptr.vmem [resolvable:$true] %s69_s28  ;;  %s91_s15 = int_to_ptr.vmem [resolvable:$true] %s90_s15 }
  0x19   :  { %s771_s18 = scalar_lea.hbm %s1287_s5, 16 }
  0x1a   :  { %p772_p8 = scmp.ne.s32.totalorder %s1287_s5, %s771_s18  ;;  %p775_p9 = scmp.lt.u32.totalorder %s771_s18, %s1287_s5 }
  0x1c   :  { %p777_p10 = pnand %p775_p9, %p772_p8 }
  0x1e   :  { %780 = shalt.err (!%p777_p10)
}
  0x1f   :  { %s781_s2 = scalar_lea.vmem %s70_s28, 16  ;;  %s785_s30 = scalar_lea.vmem %s70_s28, 32 }
  0x20   :  { %p782_p11 = scmp.ne.s32.totalorder %s70_s28, %s781_s2  ;;  %p786_p12 = scmp.lt.s32.totalorder %s70_s28, %s70_s28 }
  0x21   :  { %p787_p13 = scmp.lt.s32.totalorder %s785_s30, %s781_s2 }
  0x23   :  { %p788_p0 = por %p787_p13, %p786_p12 }
  0x25   :  { %p789_p1 = pnand %p788_p0, %p782_p11 }
  0x27   :  { %792 = shalt.err (!%p789_p1)
}
  0x28   :  { %72 = dma.hbm_to_vmem [thread:$0]  %s1287_s5, 16, %s70_s28, [#allocation9]  }
  0x29   :  { %s793_s16 = scalar_lea.hbm %s1290_s8, 512 }
  0x2a   :  { %p794_p2 = scmp.ne.s32.totalorder %s1290_s8, %s793_s16  ;;  %p797_p3 = scmp.lt.u32.totalorder %s793_s16, %s1290_s8 }
  0x2c   :  { %p799_p4 = pnand %p797_p3, %p794_p2 }
  0x2e   :  { %802 = shalt.err (!%p799_p4)
}
  0x2f   :  { %s803_s21 = scalar_lea.vmem %s91_s15, 512  ;;  %p808_p6 = scmp.lt.s32.totalorder %s91_s15, %s91_s15 }
  0x30   :  { %p804_p5 = scmp.ne.s32.totalorder %s91_s15, %s803_s21  ;;  %p809_p7 = scmp.lt.s32.totalorder %s803_s21, %s803_s21 }
  0x32   :  { %p810_p8 = por %p809_p7, %p808_p6 }
  0x34   :  { %p811_p9 = pnand %p810_p8, %p804_p5 }
  0x36   :  { %814 = shalt.err (!%p811_p9)
}
  0x37   :  { %96 = dma.hbm_to_vmem [thread:$0]  %s1290_s8, 512, %s91_s15, [#allocation12], %s1006_s23, %s1006_s23, %s1007_s24  }
  0x38   :  { %s1010_s22 = smov [#allocation2]   ;;  %s1011_s30 = smov [#allocation7]  }
  0x39   :  { %s35_s2 = sshll.u32 %s1010_s22, 4  ;;  %s57_s25 = sshll.u32 %s1011_s30, 4  ;;  %s36_s2 = int_to_ptr.vmem [resolvable:$true] %s35_s2  ;;  %s58_s25 = int_to_ptr.vmem [resolvable:$true] %s57_s25 }
  0x3a   :  { %s815_s29 = scalar_lea.hbm %s1283_s1, 32 }
  0x3b   :  { %p816_p10 = scmp.ne.s32.totalorder %s1283_s1, %s815_s29  ;;  %p819_p11 = scmp.lt.u32.totalorder %s815_s29, %s1283_s1 }
  0x3d   :  { %p821_p12 = pnand %p819_p11, %p816_p10 }
  0x3f   :  { %824 = shalt.err (!%p821_p12)
}
  0x40   :  { %s825_s8 = scalar_lea.vmem %s36_s2, 32  ;;  %p830_p0 = scmp.lt.s32.totalorder %s36_s2, %s36_s2 }
  0x41   :  { %p826_p13 = scmp.ne.s32.totalorder %s36_s2, %s825_s8  ;;  %p831_p1 = scmp.lt.s32.totalorder %s825_s8, %s825_s8 }
  0x43   :  { %p832_p2 = por %p831_p1, %p830_p0 }
  0x45   :  { %p833_p3 = pnand %p832_p2, %p826_p13 }
  0x47   :  { %836 = shalt.err (!%p833_p3)
}
  0x48   :  { %38 = dma.hbm_to_vmem [thread:$0]  %s1283_s1, 32, %s36_s2, [#allocation3]  }
  0x49   :  { %s837_s21 = scalar_lea.hbm %s1285_s3, 16 }
  0x4a   :  { %p838_p4 = scmp.ne.s32.totalorder %s1285_s3, %s837_s21  ;;  %p841_p5 = scmp.lt.u32.totalorder %s837_s21, %s1285_s3 }
  0x4c   :  { %p843_p6 = pnand %p841_p5, %p838_p4 }
  0x4e   :  { %846 = shalt.err (!%p843_p6)
}
  0x4f   :  { %s847_s26 = scalar_lea.vmem %s58_s25, 16  ;;  %s851_s27 = scalar_lea.vmem %s58_s25, 32 }
  0x50   :  { %p848_p7 = scmp.ne.s32.totalorder %s58_s25, %s847_s26  ;;  %p852_p8 = scmp.lt.s32.totalorder %s58_s25, %s58_s25 }
  0x51   :  { %p853_p9 = scmp.lt.s32.totalorder %s851_s27, %s847_s26 }
  0x53   :  { %p854_p10 = por %p853_p9, %p852_p8 }
  0x55   :  { %p855_p11 = pnand %p854_p10, %p848_p7 }
  0x57   :  { %858 = shalt.err (!%p855_p11)
}
  0x58   :  { %60 = dma.hbm_to_vmem [thread:$0]  %s1285_s3, 16, %s58_s25, [#allocation6]  }
  0x59   :  { %s1012_s29 = smov [#allocation10]   ;;  %s1013_s17 = smov [#allocation13]  }
  0x5a   :  { %s81_s16 = sshll.u32 %s1012_s29, 4  ;;  %s103_s18 = sshll.u32 %s1013_s17, 4  ;;  %s82_s16 = int_to_ptr.vmem [resolvable:$true] %s81_s16  ;;  %s104_s18 = int_to_ptr.vmem [resolvable:$true] %s103_s18 }
  0x5b   :  { %s859_s23 = scalar_lea.hbm %s1289_s7, 16 }
  0x5c   :  { %p860_p12 = scmp.ne.s32.totalorder %s1289_s7, %s859_s23  ;;  %p863_p13 = scmp.lt.u32.totalorder %s859_s23, %s1289_s7 }
  0x5e   :  { %p865_p0 = pnand %p863_p13, %p860_p12 }
  0x60   :  { %868 = shalt.err (!%p865_p0)
}
  0x61   :  { %s869_s3 = scalar_lea.vmem %s82_s16, 16  ;;  %s873_s25 = scalar_lea.vmem %s82_s16, 32 }
  0x62   :  { %p870_p1 = scmp.ne.s32.totalorder %s82_s16, %s869_s3  ;;  %p874_p2 = scmp.lt.s32.totalorder %s82_s16, %s82_s16 }
  0x63   :  { %p875_p3 = scmp.lt.s32.totalorder %s873_s25, %s869_s3 }
  0x65   :  { %p876_p4 = por %p875_p3, %p874_p2 }
  0x67   :  { %p877_p5 = pnand %p876_p4, %p870_p1 }
  0x69   :  { %880 = shalt.err (!%p877_p5)
}
  0x6a   :  { %84 = dma.hbm_to_vmem [thread:$0]  %s1289_s7, 16, %s82_s16, [#allocation9]  }
  0x6b   :  { %s881_s26 = scalar_lea.hbm %s1291_s9, 16 }
  0x6c   :  { %p882_p6 = scmp.ne.s32.totalorder %s1291_s9, %s881_s26  ;;  %p885_p7 = scmp.lt.u32.totalorder %s881_s26, %s1291_s9 }
  0x6e   :  { %p887_p8 = pnand %p885_p7, %p882_p6 }
  0x70   :  { %890 = shalt.err (!%p887_p8)
}
  0x71   :  { %s891_s17 = scalar_lea.vmem %s104_s18, 16  ;;  %s895_s19 = scalar_lea.vmem %s104_s18, 32 }
  0x72   :  { %p892_p9 = scmp.ne.s32.totalorder %s104_s18, %s891_s17  ;;  %p896_p10 = scmp.lt.s32.totalorder %s104_s18, %s104_s18 }
  0x73   :  { %p897_p11 = scmp.lt.s32.totalorder %s895_s19, %s891_s17 }
  0x75   :  { %p898_p12 = por %p897_p11, %p896_p10 }
  0x77   :  { %p899_p13 = pnand %p898_p12, %p892_p9 }
  0x79   :  { %902 = shalt.err (!%p899_p13)
}
  0x7a   :  { %106 = dma.hbm_to_vmem [thread:$0]  %s1291_s9, 16, %s104_s18, [#allocation12]  }
  0x7b   :  { %s1014_s8 = smov [#allocation14]   ;;  %s903_s20 = scalar_lea.hbm %s1293_s11, 16 }
  0x7c   :  { %s115_s23 = sshll.u32 %s1014_s8, 4  ;;  %p904_p0 = scmp.ne.s32.totalorder %s1293_s11, %s903_s20  ;;  %s116_s23 = int_to_ptr.vmem [resolvable:$true] %s115_s23 }
  0x7d   :  { %p907_p1 = scmp.lt.u32.totalorder %s903_s20, %s1293_s11 }
  0x7f   :  { %p909_p2 = pnand %p907_p1, %p904_p0 }
  0x81   :  { %912 = shalt.err (!%p909_p2)
}
  0x82   :  { %s913_s28 = scalar_lea.vmem %s116_s23, 16  ;;  %s917_s9 = scalar_lea.vmem %s116_s23, 32 }
  0x83   :  { %p914_p3 = scmp.ne.s32.totalorder %s116_s23, %s913_s28  ;;  %p918_p4 = scmp.lt.s32.totalorder %s116_s23, %s116_s23 }
  0x84   :  { %p919_p5 = scmp.lt.s32.totalorder %s917_s9, %s913_s28 }
  0x86   :  { %p920_p6 = por %p919_p5, %p918_p4 }
  0x88   :  { %p921_p7 = pnand %p920_p6, %p914_p3 }
  0x8a   :  { %924 = shalt.err (!%p921_p7)
}
  0x8b   :  { %118 = dma.hbm_to_vmem [thread:$0]  %s1293_s11, 16, %s116_s23, [#allocation15]  }
  0x8c   :  { %991 = dma.done.wait [#allocation3], 32  }
  0x8d   :  { %992 = vsyncadd [#allocation3], 4294967264 }
  0x8e   :  { %993 = dma.done.wait [#allocation6], 272  }
  0x8f   :  { %994 = vsyncadd [#allocation6], 4294967024 }
  0x90   :  { %995 = dma.done.wait [#allocation9], 32  }
  0x91   :  { %996 = vsyncadd [#allocation9], 4294967264 }
  0x92   :  { %997 = dma.done.wait [#allocation12], 528  }
  0x93   :  { %998 = vsyncadd [#allocation12], 4294966768 }
  0x94   :  { %999 = dma.done.wait [#allocation15], 16  }
  0x95   :  { %1000 = vsyncadd [#allocation15], 4294967280  ;;  %v1015_v0 = vmov 0.0|0.0   ;;  %vm1016_vm0 = vmmov 0   ;;  %v1017_v1 = vmov 0.0   ;;  %v144_v2 = vld [vmem:[#allocation5] sm:$0xff] }
  0x96   :  { %704 = vmatprep.subr.bf16.mxu0 %v1015_v0  ;;  %657 = vmatprep.mubr.msk.f32.mxu0 %vm1016_vm0, %v1017_v1  ;;  %v145_v3 = vld [vmem:[#allocation5 + $0x8] sm:$0xff]  ;;  %v228_v5 = vld [vmem:[%s1286_s4] sm:$0xff]  ;;  %vm153_vm1 = vcmask 130048   ;;  %v231_v13 = vld [vmem:[%s1286_s4 + $0x18] sm:$0xff]  ;;  %vm239_vm2 = vcmask 261120   ;;  %vm571_vm3 = vcmask 254976  }
  0x97   :  { %707 = vmatprep.subr.bf16.mxu1 %v1015_v0  ;;  %668 = vmatprep.mubr.msk.f32.mxu1 %vm1016_vm0, %v1017_v1  ;;  %v705_v4 = vpack.c.bf16 %v145_v3, %v144_v2  ;;  %v229_v6 = vld [vmem:[%s1286_s4 + $0x8] sm:$0xff]  ;;  %v313_v7 = vld [vmem:[%s1288_s6] sm:$0xff]  ;;  %v230_v12 = vld [vmem:[%s1286_s4 + $0x10] sm:$0xff]  ;;  %s1018_s22 = smov [#allocation17]  }
  0x98   :  { %v708_v8 = vpack.c.bf16 %v229_v6, %v228_v5  ;;  %v314_v9 = vld [vmem:[%s1288_s6 + $0x8] sm:$0xff]  ;;  %v143_v10 = vld [vmem:[%s1282_s0] sm:$0x3]  ;;  %v315_v14 = vld [vmem:[%s1288_s6 + $0x10] sm:$0xff]  ;;  %v711_v15 = vpack.c.bf16 %v231_v13, %v230_v12  ;;  %s590_s11 = sshll.u32 %s1018_s22, 4  ;;  %s591_s11 = int_to_ptr.vmem [resolvable:$true] %s590_s11 }
  0x99   :  { %706 = vmatpush3.bf16.msra.mxu0 %v705_v4  ;;  %v714_v11 = vpack.c.bf16 %v314_v9, %v313_v7  ;;  %v316_v16 = vld [vmem:[%s1288_s6 + $0x18] sm:$0xff]  ;;  %v620_v18 = vld [vmem:[#allocation7] ss:$0 sm:$0xff]  ;;  %v401_v24 = vld [vmem:[#allocation11 + $0x8] sm:$0xff]  ;;  %s925_s30 = scalar_lea.vmem %s591_s11, 32  ;;  %p930_p9 = scmp.lt.s32.totalorder %s591_s11, %s591_s11 }
  0x9a   :  { %713 = vmatprep.subr.bf16.mxu0 %v1015_v0  ;;  %709 = vmatpush3.bf16.msra.mxu1 %v708_v8  ;;  %v717_v17 = vpack.c.bf16 %v316_v16, %v315_v14  ;;  %v400_v23 = vld [vmem:[#allocation11] sm:$0xff]  ;;  %v402_v25 = vld [vmem:[#allocation11 + $0x10] sm:$0xff]  ;;  %v403_v27 = vld [vmem:[#allocation11 + $0x18] sm:$0xff]  ;;  %p926_p8 = scmp.ne.s32.totalorder %s591_s11, %s925_s30  ;;  %p931_p10 = scmp.lt.s32.totalorder %s925_s30, %s925_s30 }
  0x9b   :  { %710 = vmatprep.subr.bf16.mxu1 %v1015_v0  ;;  %v720_v26 = vpack.c.bf16 %v401_v24, %v400_v23  ;;  %v723_v28 = vpack.c.bf16 %v403_v27, %v402_v25  ;;  %v485_v29 = vld [vmem:[%s1292_s10] sm:$0xff]  ;;  %v486_v30 = vld [vmem:[%s1292_s10 + $0x8] sm:$0xff]  ;;  %v622_v32 = vld [vmem:[#allocation8] ss:$0 sm:$0xff] }
  0x9c   :  { %658 = vmatmul.mubr.msk.f32.vlgmr.msra.gmra.mrb[0].mxu0 %vm153_vm1, %v143_v10  ;;  %v726_v31 = vpack.c.bf16 %v486_v30, %v485_v29  ;;  %v624_v33 = vld [vmem:[#allocation10] ss:$0 sm:$0xff]  ;;  %v394_v42 = vld [vmem:[#allocation2] sm:$0x3]  ;;  %v488_v47 = vld [vmem:[%s1292_s10 + $0x18] sm:$0xff]  ;;  %p932_p11 = por %p931_p10, %p930_p9 }
  0x9d   :  { %715 = vmatpush3.bf16.msra.mxu0 %v714_v11  ;;  %679 = vmatprep.mubr.msk.f32.mxu0 %vm1016_vm0, %v1017_v1  ;;  %v487_v46 = vld [vmem:[%s1292_s10 + $0x10] sm:$0xff]  ;;  %v626_v49 = vld [vmem:[#allocation13] ss:$0 sm:$0xff] }
  0x9e   :  { %716 = vmatprep.subr.bf16.mxu0 %v1015_v0  ;;  %712 = vmatpush3.bf16.msra.mxu1 %v711_v15  ;;  %v729_v48 = vpack.c.bf16 %v488_v47, %v487_v46  ;;  %p933_p12 = pnand %p932_p11, %p926_p8 }
  0x9f   :  { %719 = vmatprep.subr.bf16.mxu1 %v1015_v0 }
  0xa1   :  { %718 = vmatpush3.bf16.msra.mxu0 %v717_v17 }
  0xa2   :  { %725 = vmatprep.subr.bf16.mxu0 %v1015_v0 }
 0x16f   :  { %v223_v19 = vpop.f32.mrb[0].mxu0 }
 0x170   :  { %v224_v20 = vadd.f32 %v620_v18, %v223_v19  ;;  %v659_v21 = vpop.f32.mrb[1].mxu0 }
 0x172   :  { %v227_v22 = vmax.f32 %v224_v20, 0.0 }
 0x174   :  { %669 = vmatmul.mubr.msk.f32.vlgmr.msra.gmra.mrb[0].mxu1 %vm239_vm2, %v227_v22  ;;  %680 = vmatmul.mubr.msk.f32.vlgmr.msra.gmra.mrb[2].mxu0 %vm239_vm2, %v227_v22 }
 0x175   :  { %690 = vmatprep.mubr.msk.f32.mxu1 %vm1016_vm0, %v1017_v1  ;;  %701 = vmatprep.mubr.msk.f32.mxu0 %vm1016_vm0, %v1017_v1 }
 0x176   :  { %721 = vmatpush3.bf16.msra.mxu1 %v720_v26  ;;  %727 = vmatpush3.bf16.msra.mxu0 %v726_v31 }
 0x177   :  { %722 = vmatprep.subr.bf16.mxu1 %v1015_v0  ;;  %728 = vmatprep.subr.bf16.mxu0 %v1015_v0 }
 0x17a   :  { %724 = vmatpush3.bf16.msra.mxu1 %v723_v28  ;;  %730 = vmatpush3.bf16.msra.mxu0 %v729_v48 }
 0x247   :  { %v309_v34 = vpop.f32.mrb[0].mxu1  ;;  %v390_v35 = vpop.f32.mrb[2].mxu0 }
 0x248   :  { %v310_v36 = vadd.f32 %v622_v32, %v309_v34  ;;  %v391_v37 = vadd.f32 %v624_v33, %v390_v35  ;;  %v670_v38 = vpop.f32.mrb[1].mxu1  ;;  %v681_v39 = vpop.f32.mrb[3].mxu0 }
 0x24a   :  { %v395_v40 = vmul.f32 0.5, %v391_v37  ;;  %572 = vst.msk [vmem:[#allocation17] sm:$0x3] %vm571_vm3, %v310_v36  ;;  %573 = vst.msk [vmem:[#allocation19] sm:$0x3] %vm571_vm3, %v391_v37 }
 0x24c   :  { %v396_v41 = vmul.f32 1.442695, %v395_v40 }
 0x24e   :  { %747 = vpow2.f32 %v396_v41 }
 0x258   :  { %v748_v43 = vpop.eup %747 }
 0x259   :  { %v398_v44 = vmul.f32 %v748_v43, %v394_v42 }
 0x25b   :  { %v399_v45 = vadd.f32 %v398_v44, %v310_v36 }
 0x25d   :  { %691 = vmatmul.mubr.msk.f32.vlgmr.msra.gmra.mrb[2].mxu1 %vm239_vm2, %v399_v45 }
 0x330   :  { %v480_v50 = vpop.f32.mrb[2].mxu1 }
 0x331   :  { %v481_v51 = vadd.f32 %v626_v49, %v480_v50  ;;  %v692_v52 = vpop.f32.mrb[3].mxu1 }
 0x333   :  { %v484_v53 = vmax.f32 %v481_v51, 0.0 }
 0x335   :  { %702 = vmatmul.mubr.msk.f32.vlgmr.msra.gmra.mrb[4].mxu0 %vm239_vm2, %v484_v53 }
 0x336   :  { %936 = shalt.err (!%p933_p12)
}
 0x337   :  { %s937_s27 = scalar_lea.hbm %s1295_s13, 32 }
 0x338   :  { %p938_p13 = scmp.ne.s32.totalorder %s1295_s13, %s937_s27  ;;  %p941_p0 = scmp.lt.u32.totalorder %s937_s27, %s1295_s13 }
 0x33a   :  { %p943_p1 = pnand %p941_p0, %p938_p13 }
 0x33c   :  { %946 = shalt.err (!%p943_p1)
}
 0x33d   :  { %593 = dma.vmem_to_hbm [thread:$0]  %s591_s11, 32, %s1295_s13, [#allocation18]  }
 0x33e   :  { %s1019_s16 = smov [#allocation19]  }
 0x33f   :  { %s600_s8 = sshll.u32 %s1019_s16, 4  ;;  %s601_s8 = int_to_ptr.vmem [resolvable:$true] %s600_s8 }
 0x340   :  { %s947_s23 = scalar_lea.vmem %s601_s8, 32  ;;  %p952_p3 = scmp.lt.s32.totalorder %s601_s8, %s601_s8 }
 0x341   :  { %p948_p2 = scmp.ne.s32.totalorder %s601_s8, %s947_s23  ;;  %p953_p4 = scmp.lt.s32.totalorder %s947_s23, %s947_s23 }
 0x343   :  { %p954_p5 = por %p953_p4, %p952_p3 }
 0x345   :  { %p955_p6 = pnand %p954_p5, %p948_p2 }
 0x347   :  { %958 = shalt.err (!%p955_p6)
}
 0x348   :  { %s959_s0 = scalar_lea.hbm %s1296_s14, 32 }
 0x349   :  { %p960_p7 = scmp.ne.s32.totalorder %s1296_s14, %s959_s0  ;;  %p963_p8 = scmp.lt.u32.totalorder %s959_s0, %s1296_s14 }
 0x34b   :  { %p965_p9 = pnand %p963_p8, %p960_p7 }
 0x34d   :  { %968 = shalt.err (!%p965_p9)
}
 0x34e   :  { %603 = dma.vmem_to_hbm [thread:$0]  %s601_s8, 32, %s1296_s14, [#allocation18]   ;;  %v628_v54 = vld [vmem:[#allocation14] ss:$0 sm:$0xff]  ;;  %vm569_vm4 = vcmask 58368  }
 0x34f   :  { %s1020_s25 = smov [#allocation16]  }
 0x350   :  { %s580_s5 = sshll.u32 %s1020_s25, 4  ;;  %s581_s5 = int_to_ptr.vmem [resolvable:$true] %s580_s5 }
 0x351   :  { %s969_s28 = scalar_lea.vmem %s581_s5, 32  ;;  %p974_p11 = scmp.lt.s32.totalorder %s581_s5, %s581_s5 }
 0x352   :  { %p970_p10 = scmp.ne.s32.totalorder %s581_s5, %s969_s28  ;;  %p975_p12 = scmp.lt.s32.totalorder %s969_s28, %s969_s28 }
 0x354   :  { %p976_p13 = por %p975_p12, %p974_p11 }
 0x356   :  { %p977_p0 = pnand %p976_p13, %p970_p10 }
 0x408   :  { %v565_v55 = vpop.f32.mrb[4].mxu0 }
 0x409   :  { %v566_v56 = vadd.f32 %v628_v54, %v565_v55  ;;  %v703_v57 = vpop.f32.mrb[5].mxu0 }
 0x40b   :  { %570 = vst.msk [vmem:[#allocation16] sm:$0x3] %vm569_vm4, %v566_v56 }
 0x40c   :  { %980 = shalt.err (!%p977_p0)
}
 0x40d   :  { %s981_s14 = scalar_lea.hbm %s1294_s12, 32 }
 0x40e   :  { %p982_p1 = scmp.ne.s32.totalorder %s1294_s12, %s981_s14  ;;  %p985_p2 = scmp.lt.u32.totalorder %s981_s14, %s1294_s12 }
 0x410   :  { %p987_p3 = pnand %p985_p2, %p982_p1 }
 0x412   :  { %990 = shalt.err (!%p987_p3)
}
 0x413   :  { %583 = dma.vmem_to_hbm [thread:$0]  %s581_s5, 32, %s1294_s12, [#allocation4]  }
 0x414   :  { %1001 = dma.done.wait [#allocation4], 32  }
 0x415   :  { %1002 = vsyncadd [#allocation4], 4294967264 }
 0x416   :  { %1003 = dma.done.wait [#allocation18], 64  }
 0x417   :  { %1004 = vsyncadd [#allocation18], 4294967232 }
 0x418   :  { %613 = vsyncpa [#allocation3], 1 }
 0x419   :  { %614 = vsyncpa [#allocation6], 1 }
 0x41a   :  { %615 = vsyncpa [#allocation9], 1 }
 0x41b   :  { %616 = vsyncpa [#allocation12], 1 }
 0x41c   :  { %617 = vsyncpa [#allocation15], 1 }
 0x41d   :  { %618 = vsyncpa [#allocation4], 1 }
 0x41e   :  { %619 = vsyncpa [#allocation18], 1 }

</bundles_post_ra>
